<compile_context>
chip_gen: v5e
topology: v5e:2x2
jax: 0.10.0
libtpu: 0.0.40
codegen_flags: <defaults>
</compile_context>

<pallas_src>
import jax
import jax.numpy as jnp
from jax.experimental import pallas as pl
from jax.experimental.pallas import tpu as pltpu


def _sigmoid(z):
    # exp lands on the EUP slot; one divide on the VPU is negligible for this
    # memory-bound kernel and keeps bit-level behavior close to the reference.
    return 1.0 / (1.0 + jnp.exp(-z))


def mlp_kernel(x_ref, w1_ref, b1_ref, w2_ref, b2_ref, w3_ref, b3_ref, o_ref):
    # x_ref: (8, TILE)  -- features on sublanes, batch on lanes
    x = x_ref[...].astype(jnp.float32)

    # layer 1: (6, 8) @ (8, TILE) + (6, 1)  -> (6, TILE)
    h1 = _sigmoid(
        jnp.dot(w1_ref[...], x, preferred_element_type=jnp.float32) + b1_ref[...]
    )
    # layer 2: (4, 6) @ (6, TILE) + (4, 1)  -> (4, TILE)
    h2 = _sigmoid(
        jnp.dot(w2_ref[...], h1, preferred_element_type=jnp.float32) + b2_ref[...]
    )
    # layer 3: (1, 4) @ (4, TILE) + (1, 1)  -> (1, TILE)  (lane-dense output)
    h3 = jnp.dot(w3_ref[...], h2, preferred_element_type=jnp.float32) + b3_ref[...]
    o_ref[...] = _sigmoid(h3).astype(o_ref.dtype)


def mlp_forward(x, params, tile=1024):
    """x: (N, 8) float32. params: dict with w{1,2,3} as (in, out), b{1,2,3} as (1, out)."""
    N = x.shape[0]

    # Transpose the whole problem: batch on the lane (last) axis.
    xt = x.T                                       # (8, N)
    w1t, b1t = params["w1"].T, params["b1"].T      # (6, 8), (6, 1)
    w2t, b2t = params["w2"].T, params["b2"].T      # (4, 6), (4, 1)
    w3t, b3t = params["w3"].T, params["b3"].T      # (1, 4), (1, 1)

    # Tile size: 1024 lanes per grid step (>= 128, multiple of 128); shrink for
    # tiny batches so we do not pad excessively.
    n_round128 = ((N + 127) // 128) * 128
    tile = min(tile, max(128, n_round128))
    n_pad = ((N + tile - 1) // tile) * tile
    if n_pad != N:
        xt = jnp.pad(xt, ((0, 0), (0, n_pad - N)))
    n_tiles = n_pad // tile

    # Full-array (grid-constant) specs for the resident weights/biases.
    resident = lambda a: pl.BlockSpec(a.shape, lambda i: (0,) * a.ndim)

    out_t = pl.pallas_call(
        mlp_kernel,
        out_shape=jax.ShapeDtypeStruct((1, n_pad), x.dtype),
        grid_spec=pltpu.PrefetchScalarGridSpec(
            num_scalar_prefetch=0,
            grid=(n_tiles,),
            in_specs=[
                pl.BlockSpec((8, tile), lambda i: (0, i)),   # streamed x tile
                resident(w1t), resident(b1t),
                resident(w2t), resident(b2t),
                resident(w3t), resident(b3t),
            ],
            out_specs=pl.BlockSpec((1, tile), lambda i: (0, i)),
        ),
        compiler_params=pltpu.CompilerParams(
            dimension_semantics=("parallel",),
            vmem_limit_bytes=32 * 1024 * 1024,
        ),
    )(xt, w1t, b1t, w2t, b2t, w3t, b3t)

    # Drop padding, back to (N, 1) row-major like the PyTorch module.
    return out_t[:, :N].T


def init_params(key):
    """Mimics torch.nn.Linear default init (U[-1/sqrt(fan_in), 1/sqrt(fan_in)])."""
    dims = [(8, 6), (6, 4), (4, 1)]
    params = {}
    keys = jax.random.split(key, 2 * len(dims))
    for i, (fan_in, fan_out) in enumerate(dims):
        bound = 1.0 / jnp.sqrt(fan_in)
        w = jax.random.uniform(keys[2 * i], (fan_in, fan_out),
                               minval=-bound, maxval=bound, dtype=jnp.float32)
        b = jax.random.uniform(keys[2 * i + 1], (1, fan_out),
                               minval=-bound, maxval=bound, dtype=jnp.float32)
        params[f"w{i + 1}"] = w
        params[f"b{i + 1}"] = b
    return params


def reference_forward(x, params):
    h = jax.nn.sigmoid(x @ params["w1"] + params["b1"])
    h = jax.nn.sigmoid(h @ params["w2"] + params["b2"])
    h = jax.nn.sigmoid(h @ params["w3"] + params["b3"])
    return h


if __name__ == "__main__":
    key = jax.random.PRNGKey(0)
    pkey, xkey1, xkey2 = jax.random.split(key, 3)
    params = init_params(pkey)

    # Small batch (pads to one 128-lane tile).
    N1 = 8
    x1 = jax.random.normal(xkey1, (N1, 8), dtype=jnp.float32)
    out1 = jax.block_until_ready(mlp_forward(x1, params))
    ref1 = reference_forward(x1, params)
    assert out1.shape == (N1, 1)
    assert jnp.allclose(out1, ref1, atol=1e-5, rtol=1e-5)

    # Larger batch exercising the multi-tile grid + padding path.
    N2 = 2000
    x2 = jax.random.normal(xkey2, (N2, 8), dtype=jnp.float32)
    out2 = jax.block_until_ready(mlp_forward(x2, params))
    ref2 = reference_forward(x2, params)
    assert out2.shape == (N2, 1)
    assert jnp.allclose(out2, ref2, atol=1e-5, rtol=1e-5)

    print("KERNEL_OK")
</pallas_src>

<mosaic_0001>
module attributes {stable_mosaic.version = 11 : i64} {
  func.func @mlp_kernel(%arg0: i32, %arg1: memref<8x128xf32, #tpu.memory_space<vmem>>, %arg2: memref<6x8xf32, #tpu.memory_space<vmem>>, %arg3: memref<6x1xf32, #tpu.memory_space<vmem>>, %arg4: memref<4x6xf32, #tpu.memory_space<vmem>>, %arg5: memref<4x1xf32, #tpu.memory_space<vmem>>, %arg6: memref<1x4xf32, #tpu.memory_space<vmem>>, %arg7: memref<1x1xf32, #tpu.memory_space<vmem>>, %arg8: memref<1x128xf32, #tpu.memory_space<vmem>>) attributes {dimension_semantics = [#tpu.dimension_semantics<parallel>], iteration_bounds = array<i64: 1>, scalar_prefetch = 0 : i64, scratch_operands = 0 : i64, tpu.core_type = #tpu.core_type<tc>, window_params = [{transform_indices = @transform_0, window_bounds = array<i64: 8, 128>}, {pipeline_mode = #tpu.pipeline_mode<synchronous>, transform_indices = @transform_1, window_bounds = array<i64: 6, 8>}, {pipeline_mode = #tpu.pipeline_mode<synchronous>, transform_indices = @transform_2, window_bounds = array<i64: 6, 1>}, {pipeline_mode = #tpu.pipeline_mode<synchronous>, transform_indices = @transform_3, window_bounds = array<i64: 4, 6>}, {pipeline_mode = #tpu.pipeline_mode<synchronous>, transform_indices = @transform_4, window_bounds = array<i64: 4, 1>}, {pipeline_mode = #tpu.pipeline_mode<synchronous>, transform_indices = @transform_5, window_bounds = array<i64: 1, 4>}, {pipeline_mode = #tpu.pipeline_mode<synchronous>, transform_indices = @transform_6, window_bounds = array<i64: 1, 1>}, {transform_indices = @transform_7, window_bounds = array<i64: 1, 128>}]} {
    %c0 = arith.constant 0 : index
    %c0_0 = arith.constant 0 : index
    %0 = vector.load %arg1[%c0, %c0_0] : memref<8x128xf32, #tpu.memory_space<vmem>>, vector<8x128xf32>
    %c0_1 = arith.constant 0 : index
    %c0_2 = arith.constant 0 : index
    %1 = vector.load %arg2[%c0_1, %c0_2] : memref<6x8xf32, #tpu.memory_space<vmem>>, vector<6x8xf32>
    %cst = arith.constant dense<0.000000e+00> : vector<6x128xf32>
    %2 = tpu.matmul %1, %0, %cst {dimension_numbers = #tpu.dot_dimension_numbers<[1], [0], [0], [1], [0, 0, 1, 1], [], []>} : vector<6x8xf32>, vector<8x128xf32>, vector<6x128xf32> -> vector<6x128xf32>
    %c0_3 = arith.constant 0 : index
    %c0_4 = arith.constant 0 : index
    %3 = vector.load %arg3[%c0_3, %c0_4] : memref<6x1xf32, #tpu.memory_space<vmem>>, vector<6x1xf32>
    %4 = vector.broadcast %3 : vector<6x1xf32> to vector<6x128xf32>
    %5 = arith.addf %2, %4 : vector<6x128xf32>
    %cst_5 = arith.constant 0.000000e+00 : f32
    %6 = vector.broadcast %cst_5 : f32 to vector<6x128xf32>
    %7 = arith.subf %6, %5 : vector<6x128xf32>
    %8 = math.exp %7 : vector<6x128xf32>
    %cst_6 = arith.constant 1.000000e+00 : f32
    %9 = vector.broadcast %cst_6 : f32 to vector<6x128xf32>
    %10 = arith.addf %9, %8 : vector<6x128xf32>
    %cst_7 = arith.constant 1.000000e+00 : f32
    %11 = vector.broadcast %cst_7 : f32 to vector<6x128xf32>
    %12 = arith.divf %11, %10 : vector<6x128xf32>
    %c0_8 = arith.constant 0 : index
    %c0_9 = arith.constant 0 : index
    %13 = vector.load %arg4[%c0_8, %c0_9] : memref<4x6xf32, #tpu.memory_space<vmem>>, vector<4x6xf32>
    %cst_10 = arith.constant dense<0.000000e+00> : vector<4x128xf32>
    %14 = tpu.matmul %13, %12, %cst_10 {dimension_numbers = #tpu.dot_dimension_numbers<[1], [0], [0], [1], [0, 0, 1, 1], [], []>} : vector<4x6xf32>, vector<6x128xf32>, vector<4x128xf32> -> vector<4x128xf32>
    %c0_11 = arith.constant 0 : index
    %c0_12 = arith.constant 0 : index
    %15 = vector.load %arg5[%c0_11, %c0_12] : memref<4x1xf32, #tpu.memory_space<vmem>>, vector<4x1xf32>
    %16 = vector.broadcast %15 : vector<4x1xf32> to vector<4x128xf32>
    %17 = arith.addf %14, %16 : vector<4x128xf32>
    %cst_13 = arith.constant 0.000000e+00 : f32
    %18 = vector.broadcast %cst_13 : f32 to vector<4x128xf32>
    %19 = arith.subf %18, %17 : vector<4x128xf32>
    %20 = math.exp %19 : vector<4x128xf32>
    %cst_14 = arith.constant 1.000000e+00 : f32
    %21 = vector.broadcast %cst_14 : f32 to vector<4x128xf32>
    %22 = arith.addf %21, %20 : vector<4x128xf32>
    %cst_15 = arith.constant 1.000000e+00 : f32
    %23 = vector.broadcast %cst_15 : f32 to vector<4x128xf32>
    %24 = arith.divf %23, %22 : vector<4x128xf32>
    %c0_16 = arith.constant 0 : index
    %c0_17 = arith.constant 0 : index
    %25 = vector.load %arg6[%c0_16, %c0_17] : memref<1x4xf32, #tpu.memory_space<vmem>>, vector<1x4xf32>
    %cst_18 = arith.constant dense<0.000000e+00> : vector<1x128xf32>
    %26 = tpu.matmul %25, %24, %cst_18 {dimension_numbers = #tpu.dot_dimension_numbers<[1], [0], [0], [1], [0, 0, 1, 1], [], []>} : vector<1x4xf32>, vector<4x128xf32>, vector<1x128xf32> -> vector<1x128xf32>
    %c0_19 = arith.constant 0 : index
    %c0_20 = arith.constant 0 : index
    %27 = vector.load %arg7[%c0_19, %c0_20] : memref<1x1xf32, #tpu.memory_space<vmem>>, vector<1x1xf32>
    %28 = vector.broadcast %27 : vector<1x1xf32> to vector<1x128xf32>
    %29 = arith.addf %26, %28 : vector<1x128xf32>
    %cst_21 = arith.constant 0.000000e+00 : f32
    %30 = vector.broadcast %cst_21 : f32 to vector<1x128xf32>
    %31 = arith.subf %30, %29 : vector<1x128xf32>
    %32 = math.exp %31 : vector<1x128xf32>
    %cst_22 = arith.constant 1.000000e+00 : f32
    %33 = vector.broadcast %cst_22 : f32 to vector<1x128xf32>
    %34 = arith.addf %33, %32 : vector<1x128xf32>
    %cst_23 = arith.constant 1.000000e+00 : f32
    %35 = vector.broadcast %cst_23 : f32 to vector<1x128xf32>
    %36 = arith.divf %35, %34 : vector<1x128xf32>
    %c0_24 = arith.constant 0 : index
    %c0_25 = arith.constant 0 : index
    %37 = vector.load %arg8[%c0_24, %c0_25] : memref<1x128xf32, #tpu.memory_space<vmem>>, vector<1x128xf32>
    tpu.vector_store %arg8[%c0_24, %c0_25], %36 {strides = array<i32>} : memref<1x128xf32, #tpu.memory_space<vmem>>, vector<1x128xf32>,
    return
  }
  func.func @transform_0(%arg0: i32) -> (i32, i32) {
    %c0_i32 = arith.constant 0 : i32
    %c0_i32_0 = arith.constant 0 : i32
    return %c0_i32, %arg0 : i32, i32
  }
  func.func @transform_1(%arg0: i32) -> (i32, i32) {
    %c0_i32 = arith.constant 0 : i32
    %c0_i32_0 = arith.constant 0 : i32
    %c0_i32_1 = arith.constant 0 : i32
    return %c0_i32, %c0_i32_0 : i32, i32
  }
  func.func @transform_2(%arg0: i32) -> (i32, i32) {
    %c0_i32 = arith.constant 0 : i32
    %c0_i32_0 = arith.constant 0 : i32
    %c0_i32_1 = arith.constant 0 : i32
    return %c0_i32, %c0_i32_0 : i32, i32
  }
  func.func @transform_3(%arg0: i32) -> (i32, i32) {
    %c0_i32 = arith.constant 0 : i32
    %c0_i32_0 = arith.constant 0 : i32
    %c0_i32_1 = arith.constant 0 : i32
    return %c0_i32, %c0_i32_0 : i32, i32
  }
  func.func @transform_4(%arg0: i32) -> (i32, i32) {
    %c0_i32 = arith.constant 0 : i32
    %c0_i32_0 = arith.constant 0 : i32
    %c0_i32_1 = arith.constant 0 : i32
    return %c0_i32, %c0_i32_0 : i32, i32
  }
  func.func @transform_5(%arg0: i32) -> (i32, i32) {
    %c0_i32 = arith.constant 0 : i32
    %c0_i32_0 = arith.constant 0 : i32
    %c0_i32_1 = arith.constant 0 : i32
    return %c0_i32, %c0_i32_0 : i32, i32
  }
  func.func @transform_6(%arg0: i32) -> (i32, i32) {
    %c0_i32 = arith.constant 0 : i32
    %c0_i32_0 = arith.constant 0 : i32
    %c0_i32_1 = arith.constant 0 : i32
    return %c0_i32, %c0_i32_0 : i32, i32
  }
  func.func @transform_7(%arg0: i32) -> (i32, i32) {
    %c0_i32 = arith.constant 0 : i32
    %c0_i32_0 = arith.constant 0 : i32
    return %c0_i32, %arg0 : i32, i32
  }
}

</mosaic_0001>

<bundles_post_ra>
// kernel: tpu_custom_call.1
= control target key start
LH: loop header
LB: loop body
LE: loop exit
PB: predicated region body
PF: predicated region fallthrough
CT: control target
= control target key end

     0   :  { %s362_s0 = inlined_call_operand.vmem [shape: f32[8,128], index: 0, kind: input, shape index: {}]   ;;  %s363_s1 = inlined_call_operand.hbm [shape: f32[6,8], index: 1, kind: input, shape index: {}]   ;;  %s364_s2 = inlined_call_operand.vmem [shape: f32[6,1], index: 2, kind: input, shape index: {}]   ;;  %s365_s3 = inlined_call_operand.vmem [shape: f32[4,6], index: 3, kind: input, shape index: {}]   ;;  %s366_s4 = inlined_call_operand.vmem [shape: f32[4,1], index: 4, kind: input, shape index: {}]   ;;  %s367_s5 = inlined_call_operand.vmem [shape: f32[1,4], index: 5, kind: input, shape index: {}]   ;;  %s368_s6 = inlined_call_operand.<no memory space> [shape: f32[1,1], index: 6, kind: input, shape index: {}]   ;;  %s369_s7 = inlined_call_operand.hbm [shape: f32[1,128], index: 7, kind: output, shape index: {}]  }
   0x1   :  { %v12_v0 = vstv %s368_s6 }
   0x2   :  { %13 = vst [vmem:[#allocation2] sm:$0x1] %v12_v0 }
   0x3   :  { %14 = vsyncpa [#allocation4], 0 }
   0x4   :  { %15 = vsyncpa [#allocation5], 0  ;;  %s23_s28 = sshll.u32 %s363_s1, 4  ;;  %s295_s29 = smov [#allocation3]   ;;  %s24_s28 = int_to_ptr.hbm [resolvable:$true] %s23_s28 }
   0x5   :  { %s25_s30 = sshll.u32 %s295_s29, 4  ;;  %s26_s30 = int_to_ptr.vmem [resolvable:$true] %s25_s30 }
   0x6   :  { %28 = dma.hbm_to_vmem [thread:$0]  %s24_s28, 128, %s26_s30, [#allocation4]  }
   0x7   :  { %291 = dma.done.wait [#allocation4], 128  }
   0x8   :  { %292 = vsyncadd [#allocation4], 4294967168  ;;  %v296_v1 = vmov 0   ;;  %vm51_vm0 = vcmask 64512   ;;  %v43_v2 = vld [vmem:[%s362_s0] sm:$0xff]  ;;  %vm105_vm4 = vcmask 1045504  }
   0x9   :  { %229 = vset.pattern.permute.xlu0 %v296_v1  ;;  %230 = vset.pattern.permute.xlu1 %v296_v1  ;;  %v44_v3 = vld [vmem:[#allocation3] sm:$0x3f]  ;;  %vm101_vm6 = vcmask 48128   ;;  %v149_v27 = vld [vmem:[#allocation2] sm:$0x1]  ;;  %vm160_vm10 = vcmask 1043456  }
   0xa   :  { %v45_v4 = vld [vmem:[%s364_s2] sm:$0x3f]  ;;  %70 = vmatpush.msra.mxu0 %v43_v2  ;;  %152 = vperm.xlu1 %230, %v149_v27   ;;  %vm156_vm12 = vcmask 31744   ;;  %s211_s15 = sshll.u32 %s369_s7, 4  ;;  %s212_s15 = int_to_ptr.hbm [resolvable:$true] %s211_s15 }
   0xb   :  { %48 = vperm.xlu0 %229, %v45_v4   ;;  %221 = vmatmul.msk.f32.vlgmr.msra.gmra.mxu0 %vm51_vm0, %v44_v3  ;;  %v95_v5 = vld [vmem:[%s366_s4] sm:$0xf] }
   0xc   :  { %v94_v22 = vld [vmem:[%s365_s3] sm:$0xf] }
   0xd   :  { %v148_v41 = vld [vmem:[%s367_s5] sm:$0x1]  ;;  %s297_s5 = smov [#allocation6]  }
   0xe   :  { %s209_s12 = sshll.u32 %s297_s5, 4  ;;  %s210_s12 = int_to_ptr.vmem [resolvable:$true] %s209_s12 }
  0x13   :  { %98 = vperm.xlu0 %229, %v95_v5  }
  0x7c   :  { %v153_v43 = vpop.permute.xlu1 %152 }
  0x7d   :  { %v49_v6 = vpop.permute.xlu0 %48  ;;  %v155_v44 = vperm.slane %v153_v43, 0 }
  0x85   :  { %v99_v24 = vpop.permute.xlu0 %98 }
  0x88   :  { %v72_v7 = vpop.f32.mrf.mxu0 }
  0x89   :  { %v73_v8 = vadd.f32 %v72_v7, %v49_v6 }
  0x8b   :  { %v75_v9 = vsub.f32 0.0, %v73_v8 }
  0x8d   :  { %v76_v10 = vmul.f32 1.442695, %v75_v9 }
  0x8f   :  { %231 = vpow2.f32 %v76_v10 }
  0x95   :  { %v232_v11 = vpop.eup %231 }
  0x96   :  { %v78_v12 = vadd.f32 1.0, %v232_v11 }
  0x98   :  { %233 = vrcp.f32 %v78_v12  ;;  %v90_v16 = vand.u32 2147483648, %v78_v12  ;;  %v88_v18 = vand.u32 2147483647, %v78_v12  ;;  %vm84_vm2 = vweird.f32 %v78_v12 }
  0x9a   :  { %v91_v20 = vor.u32 1.1754944e-38, %v90_v16  ;;  %vm89_vm5 = vcmp.eq.f32.partialorder %v88_v18, 8.507059e+37 }
  0x9e   :  { %v234_v13 = vpop.eup %233 }
  0x9f   :  { %v80_v14 = vmul.f32 %v234_v13, %v78_v12  ;;  %vm85_vm1 = vweird.f32 %v234_v13 }
  0xa0   :  { %vm86_vm3 = vmor %vm84_vm2, %vm85_vm1 }
  0xa1   :  { %v81_v15 = vsub.f32 1.0, %v80_v14 }
  0xa3   :  { %v82_v17 = vmul.f32 %v234_v13, %v81_v15 }
  0xa5   :  { %v83_v19 = vadd.f32 %v234_v13, %v82_v17 }
  0xa7   :  { %v87_v21 = vsel %vm86_vm3, %v234_v13, %v83_v19 }
  0xa8   :  { %v92_v23 = vsel %vm89_vm5, %v91_v20, %v87_v21 }
  0xa9   :  { %222 = vmatpush.msk.msra.mxu1 %vm105_vm4, %v92_v23 }
  0xaa   :  { %223 = vmatmul.msk.f32.vlgmr.msra.gmra.mxu1 %vm101_vm6, %v94_v22 }
 0x127   :  { %v126_v25 = vpop.f32.mrf.mxu1 }
 0x128   :  { %v127_v26 = vadd.f32 %v126_v25, %v99_v24 }
 0x12a   :  { %v129_v28 = vsub.f32 0.0, %v127_v26 }
 0x12c   :  { %v130_v29 = vmul.f32 1.442695, %v129_v28 }
 0x12e   :  { %235 = vpow2.f32 %v130_v29 }
 0x134   :  { %v236_v30 = vpop.eup %235 }
 0x135   :  { %v132_v31 = vadd.f32 1.0, %v236_v30 }
 0x137   :  { %237 = vrcp.f32 %v132_v31  ;;  %v144_v35 = vand.u32 2147483648, %v132_v31  ;;  %v142_v37 = vand.u32 2147483647, %v132_v31  ;;  %vm138_vm8 = vweird.f32 %v132_v31 }
 0x139   :  { %v145_v39 = vor.u32 1.1754944e-38, %v144_v35  ;;  %vm143_vm11 = vcmp.eq.f32.partialorder %v142_v37, 8.507059e+37 }
 0x13d   :  { %v238_v32 = vpop.eup %237 }
 0x13e   :  { %v134_v33 = vmul.f32 %v238_v32, %v132_v31  ;;  %vm139_vm7 = vweird.f32 %v238_v32 }
 0x13f   :  { %vm140_vm9 = vmor %vm138_vm8, %vm139_vm7 }
 0x140   :  { %v135_v34 = vsub.f32 1.0, %v134_v33 }
 0x142   :  { %v136_v36 = vmul.f32 %v238_v32, %v135_v34 }
 0x144   :  { %v137_v38 = vadd.f32 %v238_v32, %v136_v36 }
 0x146   :  { %v141_v40 = vsel %vm140_vm9, %v238_v32, %v137_v38 }
 0x147   :  { %v146_v42 = vsel %vm143_vm11, %v145_v39, %v141_v40 }
 0x148   :  { %224 = vmatpush.msk.msra.mxu2 %vm160_vm10, %v146_v42 }
 0x149   :  { %225 = vmatmul.msk.f32.vlgmr.msra.gmra.mxu2 %vm156_vm12, %v148_v41 }
 0x1cc   :  { %v181_v45 = vpop.f32.mrf.mxu2 }
 0x1cd   :  { %v182_v46 = vadd.f32 %v181_v45, %v155_v44 }
 0x1cf   :  { %v184_v47 = vsub.f32 0.0, %v182_v46 }
 0x1d1   :  { %v185_v48 = vmul.f32 1.442695, %v184_v47 }
 0x1d3   :  { %239 = vpow2.f32 %v185_v48 }
 0x1d9   :  { %v240_v49 = vpop.eup %239 }
 0x1da   :  { %v187_v50 = vadd.f32 1.0, %v240_v49 }
 0x1dc   :  { %241 = vrcp.f32 %v187_v50  ;;  %v199_v54 = vand.u32 2147483648, %v187_v50  ;;  %v197_v56 = vand.u32 2147483647, %v187_v50  ;;  %vm193_vm14 = vweird.f32 %v187_v50 }
 0x1de   :  { %v200_v58 = vor.u32 1.1754944e-38, %v199_v54  ;;  %vm198_vm0 = vcmp.eq.f32.partialorder %v197_v56, 8.507059e+37 }
 0x1e2   :  { %v242_v51 = vpop.eup %241 }
 0x1e3   :  { %v189_v52 = vmul.f32 %v242_v51, %v187_v50  ;;  %vm194_vm13 = vweird.f32 %v242_v51 }
 0x1e4   :  { %vm195_vm15 = vmor %vm193_vm14, %vm194_vm13 }
 0x1e5   :  { %v190_v53 = vsub.f32 1.0, %v189_v52 }
 0x1e7   :  { %v191_v55 = vmul.f32 %v242_v51, %v190_v53 }
 0x1e9   :  { %v192_v57 = vadd.f32 %v242_v51, %v191_v55 }
 0x1eb   :  { %v196_v59 = vsel %vm195_vm15, %v242_v51, %v192_v57 }
 0x1ec   :  { %v201_v60 = vsel %vm198_vm0, %v200_v58, %v196_v59 }
 0x1ed   :  { %203 = vst [vmem:[#allocation6] sm:$0x1] %v201_v60 }
 0x1ee   :  { %214 = dma.vmem_to_hbm [thread:$0]  %s210_s12, 16, %s212_s15, [#allocation5]  }
 0x1ef   :  { %293 = dma.done.wait [#allocation5], 16  }
 0x1f0   :  { %294 = vsyncadd [#allocation5], 4294967280 }
 0x1f1   :  { %219 = vsyncpa [#allocation4], 1 }
 0x1f2   :  { %220 = vsyncpa [#allocation5], 1 }

</bundles_post_ra>
